<compile_context>
chip_gen: v5e
topology: v5e:2x2
jax: 0.10.0
libtpu: 0.0.40
codegen_flags: <defaults>
</compile_context>

<pallas_src>
import functools
import math

import jax
import jax.numpy as jnp
from jax import lax
from jax.experimental import pallas as pl
from jax.experimental.pallas import tpu as pltpu

BN_EPS = 1e-5
LANE = 128
_FAST_PATH_BYTES = 24 << 20      # payload budget for the resident-h fast path
_FALLBACK_STEP_BYTES = 18 << 20  # per-grid-step payload budget (fallback)


def _round_up(n, m):
    return (n + m - 1) // m * m


# ---------------------------------------------------------------------------
# Kernels
# ---------------------------------------------------------------------------
def _fused_kernel(x_ref, w1_ref, gamma_ref, beta_ref, w2_ref, b2_ref, o_ref,
                  *, inv_n):
    """Single-pass fast path: whole batch resident in VMEM.
    conv1 -> BN(train batch stats) -> ReLU -> conv2.
    conv1 bias omitted (cancelled exactly by BN mean subtraction)."""
    x = x_ref[...].astype(jnp.bfloat16)               # cast on-chip (VPU filler)
    h = jnp.dot(x, w1_ref[...], preferred_element_type=jnp.float32)
    # Centered batch statistics (numerically safer than E[h^2] - mean^2).
    mean = jnp.sum(h, axis=0, keepdims=True) * inv_n
    hc = h - mean
    var = jnp.sum(hc * hc, axis=0, keepdims=True) * inv_n    # biased (BN train)
    scale = gamma_ref[...] * lax.rsqrt(var + BN_EPS)          # rsqrt -> EUP slot
    a = jnp.maximum(hc * scale + beta_ref[...], 0.0)          # fused affine+ReLU
    y = jnp.dot(a.astype(jnp.bfloat16), w2_ref[...],
                preferred_element_type=jnp.float32) + b2_ref[...]
    o_ref[...] = y.astype(o_ref.dtype)


def _stats_kernel(x_ref, w1_ref, sum_ref, sumsq_ref):
    """Fallback pass 1: per-batch-tile partial channel sums of h and h^2.
    No shared accumulator -> the batch grid axis can run "parallel"."""
    x = x_ref[...].astype(jnp.bfloat16)
    h = jnp.dot(x, w1_ref[...], preferred_element_type=jnp.float32)
    # This pass is DMA-bound (streaming x), so the VPU/XLU reductions hide
    # under the input DMA on every generation.
    sum_ref[...] = jnp.sum(h, axis=0, keepdims=True)[None]
    sumsq_ref[...] = jnp.sum(h * h, axis=0, keepdims=True)[None]


def _apply_kernel(x_ref, w1_ref, scale_ref, shift_ref, w2_ref, b2_ref, o_ref):
    """Fallback pass 2: recompute conv1, fused BN affine + ReLU, conv2 + bias."""
    x = x_ref[...].astype(jnp.bfloat16)
    h = jnp.dot(x, w1_ref[...], preferred_element_type=jnp.float32)
    a = jnp.maximum(h * scale_ref[...] + shift_ref[...], 0.0)
    y = jnp.dot(a.astype(jnp.bfloat16), w2_ref[...],
                preferred_element_type=jnp.float32) + b2_ref[...]
    o_ref[...] = y.astype(o_ref.dtype)


# ---------------------------------------------------------------------------
# Parameters
# ---------------------------------------------------------------------------
def init_params(key, input_dim, out_dim):
    """Logical (unpadded) params; conv weights pre-transposed to (Cin, Cout).
    Conv init mimics PyTorch's uniform(+-1/sqrt(fan_in)); BN gamma/beta are
    randomized (PyTorch default is ones/zeros) so the affine path is tested."""
    k1, k2, k3, k4, k5, k6 = jax.random.split(key, 6)
    b1w = 1.0 / math.sqrt(input_dim)
    b2w = 1.0 / math.sqrt(out_dim)
    return {
        "w1": jax.random.uniform(k1, (input_dim, out_dim), jnp.float32, -b1w, b1w),
        "b1": jax.random.uniform(k2, (1, out_dim), jnp.float32, -b1w, b1w),
        "gamma": jax.random.uniform(k3, (1, out_dim), jnp.float32, 0.5, 1.5),
        "beta": jax.random.normal(k4, (1, out_dim), jnp.float32) * 0.3,
        "w2": jax.random.uniform(k5, (out_dim, out_dim), jnp.float32, -b2w, b2w),
        "b2": jax.random.uniform(k6, (1, out_dim), jnp.float32, -b2w, b2w),
    }


def prepare_params(params):
    """One-time preprocessing:
      * out-channel dims padded to a multiple of 128 lanes
      * matmul weights cast to bf16; BN / bias params stay f32
      * conv1 bias dropped (BN mean subtraction cancels it)."""
    cout = params["w2"].shape[1]
    cpad = _round_up(cout, LANE)
    pad_c = cpad - cout

    def padc(a):
        return jnp.pad(a, ((0, 0), (0, pad_c)))

    # TODO(synk): also pad Cin (w1 rows) to a 128 multiple when the producer
    # can supply x already padded; padding x per call would cost more HBM
    # traffic than an aligned-K conv1 saves.
    return {
        "cout": cout,
        "w1": padc(params["w1"]).astype(jnp.bfloat16),                     # (Cin, Cpad)
        "gamma": padc(params["gamma"]),                                     # (1, Cpad) f32
        "beta": padc(params["beta"]),                                       # (1, Cpad) f32
        "w2": jnp.pad(params["w2"], ((0, pad_c), (0, pad_c))).astype(jnp.bfloat16),
        "b2": padc(params["b2"]),                                           # (1, Cpad) f32
    }


# ---------------------------------------------------------------------------
# VMEM budgeting / tiling helpers
# ---------------------------------------------------------------------------
def _vmem_limit(payload_bytes):
    """Explicit scoped-VMEM request: payload + headroom, capped below the
    smallest physical VMEM across generations (v7x: 64 MiB)."""
    return int(min(max(int(payload_bytes * 1.75) + (8 << 20), 16 << 20), 60 << 20))


def _fast_path_payload(b, cin, cpad):
    return (b * cin * 4                              # x (f32)
            + 3 * b * cpad * 4                       # h / hc / temporaries (f32)
            + b * cpad * 2                           # a (bf16)
            + b * cpad * 4                           # output (f32)
            + cin * cpad * 2 + cpad * cpad * 2       # w1, w2 (bf16)
            + 8 * cpad * 4)                          # per-channel vectors


def _apply_step_payload(tb, cin, cpad):
    return (2 * tb * cin * 4                         # x tile, double-buffered
            + 2 * tb * cpad * 4                      # out tile, double-buffered
            + 2 * (cin * cpad * 2 + cpad * cpad * 2 + 8 * cpad * 4)  # weights (dbl-buf)
            + tb * cpad * 4 + tb * cpad * 2)         # h (f32) + a (bf16)


def _pick_tile(b, cin, cpad, max_tile):
    """Largest batch tile (multiple of 8) that respects max_tile and the
    per-step VMEM budget; B is zero-padded up to a multiple of it."""
    for t in (2048, 1024, 512, 256, 128, 64, 32, 16, 8):
        if t <= max_tile and _apply_step_payload(t, cin, cpad) <= _FALLBACK_STEP_BYTES:
            return min(t, _round_up(b, 8))
    return 8


# ---------------------------------------------------------------------------
# Wrapper
# ---------------------------------------------------------------------------
def feature_trans_two_layer(x, prepared, *, fast_path_max_bytes=_FAST_PATH_BYTES,
                            max_tile=2048):
    """x: (B, Cin) float32.  Returns (B, Cout) float32 (training-mode BN
    forward; running stats are not updated, matching the module's output)."""
    B, cin = x.shape
    cout = prepared["cout"]
    cpad = prepared["w1"].shape[1]
    w1, gamma, beta, w2, b2 = (prepared[k] for k in ("w1", "gamma", "beta", "w2", "b2"))

    # TODO(synk): for very large Cout, add pipeline_mode=pl.Buffered(1) to the
    # constant-index weight specs and an N-tiling grid axis so 2*cpad^2 bf16
    # bytes stays under the per-generation VMEM budget (v7x: 64 MiB physical).
    # TODO(synk): if downstream can consume padded / bf16 activations, skip the
    # final channel slice and emit bf16 to halve output writeback bytes.

    fast_bytes = _fast_path_payload(B, cin, cpad)
    if fast_bytes <= fast_path_max_bytes:
        # ---------------- single-pass fast path (whole batch in VMEM) -------
        kernel = functools.partial(_fused_kernel, inv_n=1.0 / B)
        grid_spec = pltpu.PrefetchScalarGridSpec(
            num_scalar_prefetch=0,
            grid=(1,),
            in_specs=[
                pl.BlockSpec((B, cin), lambda i: (0, 0)),       # x (f32, cast in-kernel)
                pl.BlockSpec((cin, cpad), lambda i: (0, 0)),    # w1
                pl.BlockSpec((1, cpad), lambda i: (0, 0)),      # gamma
                pl.BlockSpec((1, cpad), lambda i: (0, 0)),      # beta
                pl.BlockSpec((cpad, cpad), lambda i: (0, 0)),   # w2
                pl.BlockSpec((1, cpad), lambda i: (0, 0)),      # b2
            ],
            out_specs=pl.BlockSpec((B, cpad), lambda i: (0, 0)),
        )
        out = pl.pallas_call(
            kernel,
            out_shape=jax.ShapeDtypeStruct((B, cpad), jnp.float32),
            grid_spec=grid_spec,
            compiler_params=pltpu.CompilerParams(
                dimension_semantics=("arbitrary",),
                vmem_limit_bytes=_vmem_limit(fast_bytes)),
        )(x, w1, gamma, beta, w2, b2)
        return out[:, :cout] if cout != cpad else out

    # ---------------- large-B fallback: stats pass + apply pass -------------
    tb = _pick_tile(B, cin, cpad, max_tile)
    Bp = _round_up(B, tb)
    nbt = Bp // tb
    if Bp != B:
        # Zero-padded rows are exact no-ops for the batch statistics because
        # conv1 carries no bias inside the kernel (their h rows are 0), and
        # their output rows are sliced off below.
        x = jnp.pad(x, ((0, Bp - B), (0, 0)))

    const2 = lambda i: (0, 0)

    # Pass 1: per-tile partial sums (batch axis "parallel": no shared scratch,
    # so v7x can split the tiles across its two TensorCores).
    stats_bytes = (2 * tb * cin * 4 + 2 * cin * cpad * 2
                   + 2 * tb * cpad * 4 + 8 * cpad * 4)
    stats_spec = pltpu.PrefetchScalarGridSpec(
        num_scalar_prefetch=0,
        grid=(nbt,),
        in_specs=[
            pl.BlockSpec((tb, cin), lambda i: (i, 0)),
            pl.BlockSpec((cin, cpad), const2),                  # VMEM-resident
        ],
        out_specs=[
            pl.BlockSpec((1, 1, cpad), lambda i: (i, 0, 0)),
            pl.BlockSpec((1, 1, cpad), lambda i: (i, 0, 0)),
        ],
    )
    p_sum, p_sumsq = pl.pallas_call(
        _stats_kernel,
        out_shape=(jax.ShapeDtypeStruct((nbt, 1, cpad), jnp.float32),
                   jax.ShapeDtypeStruct((nbt, 1, cpad), jnp.float32)),
        grid_spec=stats_spec,
        compiler_params=pltpu.CompilerParams(
            dimension_semantics=("parallel",),
            vmem_limit_bytes=_vmem_limit(stats_bytes)),
    )(x, w1)

    # Tiny f32 combine in the wrapper (Cpad elements): fused BN scale / shift.
    inv_n = 1.0 / B                                    # true batch size
    sum_h = jnp.sum(p_sum, axis=0)                     # (1, cpad)
    sum_h2 = jnp.sum(p_sumsq, axis=0)                  # (1, cpad)
    mean = sum_h * inv_n
    var = jnp.maximum(sum_h2 * inv_n - mean * mean, 0.0)   # clamp: cancellation guard
    scale = gamma * lax.rsqrt(var + BN_EPS)
    shift = beta - mean * scale

    # Pass 2: apply (batch axis "parallel"); weights stay VMEM-resident.
    apply_bytes = _apply_step_payload(tb, cin, cpad)
    apply_spec = pltpu.PrefetchScalarGridSpec(
        num_scalar_prefetch=0,
        grid=(nbt,),
        in_specs=[
            pl.BlockSpec((tb, cin), lambda i: (i, 0)),
            pl.BlockSpec((cin, cpad), const2),
            pl.BlockSpec((1, cpad), const2),
            pl.BlockSpec((1, cpad), const2),
            pl.BlockSpec((cpad, cpad), const2),
            pl.BlockSpec((1, cpad), const2),
        ],
        out_specs=pl.BlockSpec((tb, cpad), lambda i: (i, 0)),
    )
    out = pl.pallas_call(
        _apply_kernel,
        out_shape=jax.ShapeDtypeStruct((Bp, cpad), jnp.float32),
        grid_spec=apply_spec,
        compiler_params=pltpu.CompilerParams(
            dimension_semantics=("parallel",),
            vmem_limit_bytes=_vmem_limit(apply_bytes)),
    )(x, w1, scale, shift, w2, b2)

    out = out[:B] if Bp != B else out
    return out[:, :cout] if cout != cpad else out


# ---------------------------------------------------------------------------
# Reference + test
# ---------------------------------------------------------------------------
def _reference(x, p):
    """Pure-JAX f32 reference with full PyTorch semantics (conv1 bias kept)."""
    h = x @ p["w1"] + p["b1"]
    mean = jnp.mean(h, axis=0, keepdims=True)
    var = jnp.mean((h - mean) ** 2, axis=0, keepdims=True)   # biased (BN train)
    h = (h - mean) / jnp.sqrt(var + BN_EPS) * p["gamma"] + p["beta"]
    h = jnp.maximum(h, 0.0)
    return h @ p["w2"] + p["b2"]


if __name__ == "__main__":
    key = jax.random.PRNGKey(0)

    # (B, Cin, Cout, force_fallback, max_tile):
    #   1) module defaults -> single-pass fused fast path
    #   2) non-128-multiple Cout + small tiles -> fallback with 2 batch tiles
    #   3) B not a tile multiple -> fallback with zero-padded batch rows
    cases = (
        (16, 100, 256, False, 2048),
        (32, 48, 80, True, 16),
        (20, 64, 96, True, 16),
    )
    for B, cin, cout, force_fallback, max_tile in cases:
        key, kx, kp = jax.random.split(key, 3)
        x = jax.random.normal(kx, (B, cin), dtype=jnp.float32)
        params = init_params(kp, cin, cout)
        prepared = prepare_params(params)

        fast_budget = 0 if force_fallback else _FAST_PATH_BYTES
        out = feature_trans_two_layer(x, prepared,
                                      fast_path_max_bytes=fast_budget,
                                      max_tile=max_tile)
        out = jax.block_until_ready(out)

        ref = _reference(x, params)
        assert out.shape == (B, cout)
        # bf16 MXU operands -> loose tolerance vs the f32 reference.  The
        # reference includes conv1's bias while the kernel omits it, so a
        # match also verifies the BN bias cancellation.
        if not jnp.allclose(out, ref, atol=5e-2, rtol=5e-2):
            err = float(jnp.max(jnp.abs(out - ref)))
            raise AssertionError(
                f"mismatch vs reference at (B={B}, Cin={cin}, Cout={cout}): "
                f"max abs err {err}")

    print("KERNEL_OK")
</pallas_src>

<mosaic_0001>
module attributes {stable_mosaic.version = 11 : i64} {
  func.func @_fused_kernel(%arg0: i32, %arg1: memref<16x100xf32, #tpu.memory_space<vmem>>, %arg2: memref<100x256xbf16, #tpu.memory_space<vmem>>, %arg3: memref<1x256xf32, #tpu.memory_space<vmem>>, %arg4: memref<1x256xf32, #tpu.memory_space<vmem>>, %arg5: memref<256x256xbf16, #tpu.memory_space<vmem>>, %arg6: memref<1x256xf32, #tpu.memory_space<vmem>>, %arg7: memref<16x256xf32, #tpu.memory_space<vmem>>) attributes {dimension_semantics = [#tpu.dimension_semantics<arbitrary>], iteration_bounds = array<i64: 1>, scalar_prefetch = 0 : i64, scratch_operands = 0 : i64, tpu.core_type = #tpu.core_type<tc>, window_params = [{pipeline_mode = #tpu.pipeline_mode<synchronous>, transform_indices = @transform_0, window_bounds = array<i64: 16, 100>}, {pipeline_mode = #tpu.pipeline_mode<synchronous>, transform_indices = @transform_1, window_bounds = array<i64: 100, 256>}, {pipeline_mode = #tpu.pipeline_mode<synchronous>, transform_indices = @transform_2, window_bounds = array<i64: 1, 256>}, {pipeline_mode = #tpu.pipeline_mode<synchronous>, transform_indices = @transform_3, window_bounds = array<i64: 1, 256>}, {pipeline_mode = #tpu.pipeline_mode<synchronous>, transform_indices = @transform_4, window_bounds = array<i64: 256, 256>}, {pipeline_mode = #tpu.pipeline_mode<synchronous>, transform_indices = @transform_5, window_bounds = array<i64: 1, 256>}, {pipeline_mode = #tpu.pipeline_mode<synchronous>, transform_indices = @transform_6, window_bounds = array<i64: 16, 256>}]} {
    %c0 = arith.constant 0 : index
    %c0_0 = arith.constant 0 : index
    %0 = vector.load %arg1[%c0, %c0_0] : memref<16x100xf32, #tpu.memory_space<vmem>>, vector<16x100xf32>
    %1 = arith.truncf %0 : vector<16x100xf32> to vector<16x100xbf16>
    %c0_1 = arith.constant 0 : index
    %c0_2 = arith.constant 0 : index
    %2 = vector.load %arg2[%c0_1, %c0_2] : memref<100x256xbf16, #tpu.memory_space<vmem>>, vector<100x256xbf16>
    %cst = arith.constant dense<0.000000e+00> : vector<16x256xf32>
    %3 = tpu.matmul %1, %2, %cst {dimension_numbers = #tpu.dot_dimension_numbers<[1], [0], [0], [1], [0, 0, 1, 1], [], []>} : vector<16x100xbf16>, vector<100x256xbf16>, vector<16x256xf32> -> vector<16x256xf32>
    %cst_3 = arith.constant dense<0.000000e+00> : vector<256xf32>
    %4 = vector.multi_reduction <add>, %3, %cst_3 [0] : vector<16x256xf32> to vector<256xf32>
    %5 = vector.shape_cast %4 : vector<256xf32> to vector<1x256xf32>
    %cst_4 = arith.constant 6.250000e-02 : f32
    %6 = vector.broadcast %cst_4 : f32 to vector<1x256xf32>
    %7 = arith.mulf %5, %6 : vector<1x256xf32>
    %8 = vector.broadcast %7 : vector<1x256xf32> to vector<16x256xf32>
    %9 = arith.subf %3, %8 : vector<16x256xf32>
    %10 = arith.mulf %9, %9 : vector<16x256xf32>
    %cst_5 = arith.constant dense<0.000000e+00> : vector<256xf32>
    %11 = vector.multi_reduction <add>, %10, %cst_5 [0] : vector<16x256xf32> to vector<256xf32>
    %12 = vector.shape_cast %11 : vector<256xf32> to vector<1x256xf32>
    %cst_6 = arith.constant 6.250000e-02 : f32
    %13 = vector.broadcast %cst_6 : f32 to vector<1x256xf32>
    %14 = arith.mulf %12, %13 : vector<1x256xf32>
    %c0_7 = arith.constant 0 : index
    %c0_8 = arith.constant 0 : index
    %15 = vector.load %arg3[%c0_7, %c0_8] : memref<1x256xf32, #tpu.memory_space<vmem>>, vector<1x256xf32>
    %cst_9 = arith.constant 9.99999974E-6 : f32
    %16 = vector.broadcast %cst_9 : f32 to vector<1x256xf32>
    %17 = arith.addf %14, %16 : vector<1x256xf32>
    %18 = math.rsqrt %17 : vector<1x256xf32>
    %19 = arith.mulf %15, %18 : vector<1x256xf32>
    %20 = vector.broadcast %19 : vector<1x256xf32> to vector<16x256xf32>
    %21 = arith.mulf %9, %20 : vector<16x256xf32>
    %c0_10 = arith.constant 0 : index
    %c0_11 = arith.constant 0 : index
    %22 = vector.load %arg4[%c0_10, %c0_11] : memref<1x256xf32, #tpu.memory_space<vmem>>, vector<1x256xf32>
    %23 = vector.broadcast %22 : vector<1x256xf32> to vector<16x256xf32>
    %24 = arith.addf %21, %23 : vector<16x256xf32>
    %cst_12 = arith.constant 0.000000e+00 : f32
    %25 = vector.broadcast %cst_12 : f32 to vector<16x256xf32>
    %26 = arith.maximumf %24, %25 : vector<16x256xf32>
    %27 = arith.truncf %26 : vector<16x256xf32> to vector<16x256xbf16>
    %c0_13 = arith.constant 0 : index
    %c0_14 = arith.constant 0 : index
    %28 = vector.load %arg5[%c0_13, %c0_14] : memref<256x256xbf16, #tpu.memory_space<vmem>>, vector<256x256xbf16>
    %cst_15 = arith.constant dense<0.000000e+00> : vector<16x256xf32>
    %29 = tpu.matmul %27, %28, %cst_15 {dimension_numbers = #tpu.dot_dimension_numbers<[1], [0], [0], [1], [0, 0, 1, 1], [], []>} : vector<16x256xbf16>, vector<256x256xbf16>, vector<16x256xf32> -> vector<16x256xf32>
    %c0_16 = arith.constant 0 : index
    %c0_17 = arith.constant 0 : index
    %30 = vector.load %arg6[%c0_16, %c0_17] : memref<1x256xf32, #tpu.memory_space<vmem>>, vector<1x256xf32>
    %31 = vector.broadcast %30 : vector<1x256xf32> to vector<16x256xf32>
    %32 = arith.addf %29, %31 : vector<16x256xf32>
    %c0_18 = arith.constant 0 : index
    %c0_19 = arith.constant 0 : index
    %33 = vector.load %arg7[%c0_18, %c0_19] : memref<16x256xf32, #tpu.memory_space<vmem>>, vector<16x256xf32>
    tpu.vector_store %arg7[%c0_18, %c0_19], %32 {strides = array<i32>} : memref<16x256xf32, #tpu.memory_space<vmem>>, vector<16x256xf32>,
    return
  }
  func.func @transform_0(%arg0: i32) -> (i32, i32) {
    %c0_i32 = arith.constant 0 : i32
    %c0_i32_0 = arith.constant 0 : i32
    %c0_i32_1 = arith.constant 0 : i32
    return %c0_i32, %c0_i32_0 : i32, i32
  }
  func.func @transform_1(%arg0: i32) -> (i32, i32) {
    %c0_i32 = arith.constant 0 : i32
    %c0_i32_0 = arith.constant 0 : i32
    %c0_i32_1 = arith.constant 0 : i32
    return %c0_i32, %c0_i32_0 : i32, i32
  }
  func.func @transform_2(%arg0: i32) -> (i32, i32) {
    %c0_i32 = arith.constant 0 : i32
    %c0_i32_0 = arith.constant 0 : i32
    %c0_i32_1 = arith.constant 0 : i32
    return %c0_i32, %c0_i32_0 : i32, i32
  }
  func.func @transform_3(%arg0: i32) -> (i32, i32) {
    %c0_i32 = arith.constant 0 : i32
    %c0_i32_0 = arith.constant 0 : i32
    %c0_i32_1 = arith.constant 0 : i32
    return %c0_i32, %c0_i32_0 : i32, i32
  }
  func.func @transform_4(%arg0: i32) -> (i32, i32) {
    %c0_i32 = arith.constant 0 : i32
    %c0_i32_0 = arith.constant 0 : i32
    %c0_i32_1 = arith.constant 0 : i32
    return %c0_i32, %c0_i32_0 : i32, i32
  }
  func.func @transform_5(%arg0: i32) -> (i32, i32) {
    %c0_i32 = arith.constant 0 : i32
    %c0_i32_0 = arith.constant 0 : i32
    %c0_i32_1 = arith.constant 0 : i32
    return %c0_i32, %c0_i32_0 : i32, i32
  }
  func.func @transform_6(%arg0: i32) -> (i32, i32) {
    %c0_i32 = arith.constant 0 : i32
    %c0_i32_0 = arith.constant 0 : i32
    %c0_i32_1 = arith.constant 0 : i32
    return %c0_i32, %c0_i32_0 : i32, i32
  }
}

</mosaic_0001>

<bundles_post_ra>
// kernel: tpu_custom_call.1
= control target key start
LH: loop header
LB: loop body
LE: loop exit
PB: predicated region body
PF: predicated region fallthrough
CT: control target
= control target key end

     0   :  { %11 = vsyncpa [#allocation3], 0  ;;  %s1028_s0 = inlined_call_operand.hbm [shape: f32[16,100], index: 0, kind: input, shape index: {}]   ;;  %s1029_s1 = inlined_call_operand.hbm [shape: bf16[100,256], index: 1, kind: input, shape index: {}]   ;;  %s1030_s2 = inlined_call_operand.hbm [shape: f32[1,256], index: 2, kind: input, shape index: {}]   ;;  %s1031_s3 = inlined_call_operand.vmem [shape: f32[1,256], index: 3, kind: input, shape index: {}]   ;;  %s1032_s4 = inlined_call_operand.hbm [shape: bf16[256,256], index: 4, kind: input, shape index: {}]   ;;  %s1033_s5 = inlined_call_operand.vmem [shape: f32[1,256], index: 5, kind: input, shape index: {}]   ;;  %s1034_s6 = inlined_call_operand.hbm [shape: f32[16,256], index: 6, kind: output, shape index: {}]  }
   0x1   :  { %12 = vsyncpa [#allocation6], 0 }
   0x2   :  { %13 = vsyncpa [#allocation9], 0 }
   0x3   :  { %14 = vsyncpa [#allocation4], 0  ;;  %s32_s23 = sshll.u32 %s1029_s1, 4  ;;  %s943_s24 = smov [#allocation5]   ;;  %s33_s23 = int_to_ptr.hbm [resolvable:$true] %s32_s23 }
   0x4   :  { %s34_s25 = sshll.u32 %s943_s24, 4  ;;  %s19_s28 = sshll.u32 %s1028_s0, 4  ;;  %s35_s25 = int_to_ptr.vmem [resolvable:$true] %s34_s25  ;;  %s20_s28 = int_to_ptr.hbm [resolvable:$true] %s19_s28 }
   0x5   :  { %s944_s29 = smov 128   ;;  %s945_s30 = smov 8  }
   0x6   :  { %40 = dma.hbm_to_vmem [thread:$0]  %s33_s23, 1664, %s35_s25, [#allocation6], %s944_s29, %s944_s29, %s945_s30  }
   0x7   :  { %s946_s7 = smov [#allocation2]   ;;  %s46_s11 = sshll.u32 %s1030_s2, 4  ;;  %s47_s11 = int_to_ptr.hbm [resolvable:$true] %s46_s11 }
   0x8   :  { %s21_s8 = sshll.u32 %s946_s7, 4  ;;  %s58_s13 = sshll.u32 %s1032_s4, 4  ;;  %s22_s8 = int_to_ptr.vmem [resolvable:$true] %s21_s8  ;;  %s59_s13 = int_to_ptr.hbm [resolvable:$true] %s58_s13 }
   0x9   :  { %27 = dma.hbm_to_vmem [thread:$0]  %s20_s28, 256, %s22_s8, [#allocation3], %s944_s29, %s944_s29, %s945_s30  }
   0xa   :  { %s947_s14 = smov [#allocation7]   ;;  %s948_s0 = smov [#allocation8]  }
   0xb   :  { %s48_s15 = sshll.u32 %s947_s14, 4  ;;  %s60_s16 = sshll.u32 %s948_s0, 4  ;;  %s49_s15 = int_to_ptr.vmem [resolvable:$true] %s48_s15  ;;  %s61_s16 = int_to_ptr.vmem [resolvable:$true] %s60_s16 }
   0xc   :  { %51 = dma.hbm_to_vmem [thread:$0]  %s47_s11, 32, %s49_s15, [#allocation6]  }
   0xd   :  { %66 = dma.hbm_to_vmem [thread:$0]  %s59_s13, 4096, %s61_s16, [#allocation9], %s944_s29, %s944_s29, %s945_s30  }
   0xe   :  { %935 = dma.done.wait [#allocation3], 256  }
   0xf   :  { %936 = vsyncadd [#allocation3], 4294967040 }
  0x10   :  { %937 = dma.done.wait [#allocation6], 1696  }
  0x11   :  { %938 = vsyncadd [#allocation6], 4294965600 }
  0x12   :  { %939 = dma.done.wait [#allocation9], 4096  }
  0x13   :  { %940 = vsyncadd [#allocation9], 4294963200  ;;  %v101_v0 = vld [vmem:[#allocation5 + $0x60] sm:$0x33]  ;;  %vm171_vm0 = vcmask 1041408   ;;  %v86_v43 = vld [vmem:[#allocation2] sm:$0xff] }
  0x14   :  { %v139_v1 = vunpack.c.l.b16 %v101_v0  ;;  %v140_v2 = vunpack.c.h.b16 %v101_v0  ;;  %v622_v3 = vld [vmem:[#allocation5 + $0x50] sm:$0xf]  ;;  %v769_v6 = vld [vmem:[#allocation5 + $0x54] sm:$0xf0]  ;;  %v768_v7 = vld [vmem:[#allocation5 + $0x54] sm:$0xf] }
  0x15   :  { %v624_v8 = vld [vmem:[#allocation5 + $0x58] sm:$0xf0]  ;;  %v623_v11 = vor.u32 %v769_v6, %v622_v3  ;;  %v614_v13 = vld [vmem:[#allocation5 + $0x40] sm:$0xf]  ;;  %v767_v14 = vld [vmem:[#allocation5 + $0x44] sm:$0xf0] }
  0x16   :  { %v153_v4 = vpack.c.b16 %v139_v1, %v139_v1  ;;  %v154_v5 = vpack.c.b16 %v140_v2, %v140_v2  ;;  %v627_v12 = vor.u32 %v768_v7, %v624_v8  ;;  %v766_v15 = vld [vmem:[#allocation5 + $0x44] sm:$0xf]  ;;  %v616_v16 = vld [vmem:[#allocation5 + $0x48] sm:$0xf0]  ;;  %v615_v17 = vor.u32 %v767_v14, %v614_v13  ;;  %v606_v19 = vld [vmem:[#allocation5 + $0x30] sm:$0xf] }
  0x17   :  { %v619_v18 = vor.u32 %v766_v15, %v616_v16  ;;  %v765_v20 = vld [vmem:[#allocation5 + $0x34] sm:$0xf0]  ;;  %v764_v21 = vld [vmem:[#allocation5 + $0x34] sm:$0xf]  ;;  %v608_v22 = vld [vmem:[#allocation5 + $0x38] sm:$0xf0] }
  0x18   :  { %v173_v9 = vsel %vm171_vm0, %v153_v4, 0  ;;  %v176_v10 = vsel %vm171_vm0, %v154_v5, 0  ;;  %v607_v23 = vor.u32 %v765_v20, %v606_v19  ;;  %v611_v24 = vor.u32 %v764_v21, %v608_v22  ;;  %v598_v25 = vld [vmem:[#allocation5 + $0x20] sm:$0xf]  ;;  %v763_v26 = vld [vmem:[#allocation5 + $0x24] sm:$0xf0] }
  0x19   :  { %179 = vmatpush.bf16.msra.mxu0 %v173_v9  ;;  %193 = vmatpush.bf16.msra.mxu1 %v176_v10  ;;  %v762_v27 = vld [vmem:[#allocation5 + $0x24] sm:$0xf]  ;;  %v600_v28 = vld [vmem:[#allocation5 + $0x28] sm:$0xf0]  ;;  %v599_v29 = vor.u32 %v763_v26, %v598_v25  ;;  %v590_v31 = vld [vmem:[#allocation5 + $0x10] sm:$0xf] }
  0x1a   :  { %v603_v30 = vor.u32 %v762_v27, %v600_v28  ;;  %v761_v32 = vld [vmem:[#allocation5 + $0x14] sm:$0xf0]  ;;  %v760_v33 = vld [vmem:[#allocation5 + $0x14] sm:$0xf]  ;;  %v592_v34 = vld [vmem:[#allocation5 + $0x18] sm:$0xf0] }
  0x1b   :  { %v591_v35 = vor.u32 %v761_v32, %v590_v31  ;;  %v595_v36 = vor.u32 %v760_v33, %v592_v34  ;;  %v582_v37 = vld [vmem:[#allocation5] sm:$0xf]  ;;  %v759_v38 = vld [vmem:[#allocation5 + $0x4] sm:$0xf0]  ;;  %v758_v39 = vld [vmem:[#allocation5 + $0x4] sm:$0xf] }
  0x1c   :  { %v584_v40 = vld [vmem:[#allocation5 + $0x8] sm:$0xf0]  ;;  %v583_v41 = vor.u32 %v759_v38, %v582_v37  ;;  %v87_v44 = vld [vmem:[#allocation2 + $0x8] sm:$0xff]  ;;  %vm167_vm1 = vcmask 818176   ;;  %v785_v59 = vld [vmem:[#allocation8 + $0x74] sm:$0xf0] }
  0x1d   :  { %180 = vmatpush.bf16.msra.mxu0 %v623_v11  ;;  %194 = vmatpush.bf16.msra.mxu1 %v627_v12  ;;  %v587_v42 = vor.u32 %v758_v39, %v584_v40  ;;  %v88_v45 = vpack.c.bf16 %v87_v44, %v86_v43  ;;  %v688_v58 = vld [vmem:[#allocation8 + $0x70] sm:$0xf]  ;;  %v801_v62 = vld [vmem:[#allocation8 + $0xf4] sm:$0xf0]  ;;  %v784_v63 = vld [vmem:[#allocation8 + $0x74] sm:$0xf] }
  0x1e   :  { %v689_v60 = vor.u32 %v785_v59, %v688_v58  ;;  %v752_v61 = vld [vmem:[#allocation8 + $0xf0] sm:$0xf]  ;;  %v690_v3 = vld [vmem:[#allocation8 + $0x78] sm:$0xf0]  ;;  %v800_v4 = vld [vmem:[#allocation8 + $0xf4] sm:$0xf] }
  0x1f   :  { %v753_v2 = vor.u32 %v801_v62, %v752_v61  ;;  %v754_v5 = vld [vmem:[#allocation8 + $0xf8] sm:$0xf0]  ;;  %v693_v6 = vor.u32 %v784_v63, %v690_v3  ;;  %v680_v10 = vld [vmem:[#allocation8 + $0x60] sm:$0xf]  ;;  %v783_v11 = vld [vmem:[#allocation8 + $0x64] sm:$0xf0] }
  0x20   :  { %499 = vmatpush.bf16.msra.mxu2 %v689_v60  ;;  %v757_v7 = vor.u32 %v800_v4, %v754_v5  ;;  %v681_v12 = vor.u32 %v783_v11, %v680_v10  ;;  %v744_v13 = vld [vmem:[#allocation8 + $0xe0] sm:$0xf]  ;;  %v799_v14 = vld [vmem:[#allocation8 + $0xe4] sm:$0xf0]  ;;  %v782_v15 = vld [vmem:[#allocation8 + $0x64] sm:$0xf] }
  0x21   :  { %181 = vmatpush.bf16.msra.mxu0 %v615_v17  ;;  %195 = vmatpush.bf16.msra.mxu1 %v619_v18  ;;  %v745_v18 = vor.u32 %v799_v14, %v744_v13  ;;  %v682_v19 = vld [vmem:[#allocation8 + $0x68] sm:$0xf0]  ;;  %v798_v20 = vld [vmem:[#allocation8 + $0xe4] sm:$0xf]  ;;  %v672_v26 = vld [vmem:[#allocation8 + $0x50] sm:$0xf] }
  0x22   :  { %513 = vmatpush.bf16.msra.mxu3 %v753_v2  ;;  %v746_v21 = vld [vmem:[#allocation8 + $0xe8] sm:$0xf0]  ;;  %v685_v22 = vor.u32 %v782_v15, %v682_v19  ;;  %v781_v27 = vld [vmem:[#allocation8 + $0x54] sm:$0xf0]  ;;  %v780_v31 = vld [vmem:[#allocation8 + $0x54] sm:$0xf] }
  0x23   :  { %v673_v28 = vor.u32 %v781_v27, %v672_v26  ;;  %v796_v37 = vld [vmem:[#allocation8 + $0xd4] sm:$0xf]  ;;  %v738_v38 = vld [vmem:[#allocation8 + $0xd8] sm:$0xf0]  ;;  %v730_v58 = vld [vmem:[#allocation8 + $0xc8] sm:$0xf0] }
  0x24   :  { %500 = vmatpush.bf16.msra.mxu2 %v681_v12  ;;  %v656_v62 = vld [vmem:[#allocation8 + $0x30] sm:$0xf]  ;;  %v777_v63 = vld [vmem:[#allocation8 + $0x34] sm:$0xf0]  ;;  %v776_v3 = vld [vmem:[#allocation8 + $0x34] sm:$0xf] }
  0x25   :  { %182 = vmatpush.bf16.msra.mxu0 %v607_v23  ;;  %196 = vmatpush.bf16.msra.mxu1 %v611_v24  ;;  %v749_v23 = vor.u32 %v798_v20, %v746_v21  ;;  %v793_v2 = vld [vmem:[#allocation8 + $0xb4] sm:$0xf0]  ;;  %v648_v14 = vld [vmem:[#allocation8 + $0x20] sm:$0xf]  ;;  %v775_v15 = vld [vmem:[#allocation8 + $0x24] sm:$0xf0] }
  0x26   :  { %514 = vmatpush.bf16.msra.mxu3 %v745_v18  ;;  %v791_v18 = vld [vmem:[#allocation8 + $0xa4] sm:$0xf0]  ;;  %v774_v19 = vld [vmem:[#allocation8 + $0x24] sm:$0xf]  ;;  %vm272_vm7 = vcmask 1040384   ;;  %s949_s18 = smov [#allocation10]  }
  0x27   :  { %s563_s19 = sshll.u32 %s949_s18, 4  ;;  %s565_s21 = sshll.u32 %s1034_s6, 4  ;;  %s564_s19 = int_to_ptr.vmem [resolvable:$true] %s563_s19  ;;  %s566_s21 = int_to_ptr.hbm [resolvable:$true] %s565_s21 }
  0x28   :  { %501 = vmatpush.bf16.msra.mxu2 %v673_v28  ;;  %s950_s22 = smov 256   ;;  %s951_s23 = smov 16  }
  0x29   :  { %183 = vmatpush.bf16.msra.mxu0 %v599_v29  ;;  %197 = vmatpush.bf16.msra.mxu1 %v603_v30  ;;  %v736_v29 = vld [vmem:[#allocation8 + $0xd0] sm:$0xf]  ;;  %v797_v30 = vld [vmem:[#allocation8 + $0xd4] sm:$0xf0] }
  0x2a   :  { %v737_v39 = vor.u32 %v797_v30, %v736_v29  ;;  %v640_v30 = vld [vmem:[#allocation8 + $0x10] sm:$0xf] }
  0x2c   :  { %515 = vmatpush.bf16.msra.mxu3 %v737_v39  ;;  %v772_v39 = vld [vmem:[#allocation8 + $0x14] sm:$0xf] }
  0x2d   :  { %184 = vmatpush.bf16.msra.mxu0 %v591_v35  ;;  %198 = vmatpush.bf16.msra.mxu1 %v595_v36  ;;  %v674_v36 = vld [vmem:[#allocation8 + $0x58] sm:$0xf0] }
  0x2e   :  { %v677_v40 = vor.u32 %v780_v31, %v674_v36  ;;  %v773_v31 = vld [vmem:[#allocation8 + $0x14] sm:$0xf0] }
  0x2f   :  { %v641_v36 = vor.u32 %v773_v31, %v640_v30 }
  0x31   :  { %185 = vmatpush.bf16.msra.mxu0 %v583_v41  ;;  %199 = vmatpush.bf16.msra.mxu1 %v587_v42  ;;  %v741_v41 = vor.u32 %v796_v37, %v738_v38  ;;  %v704_v37 = vld [vmem:[#allocation8 + $0x90] sm:$0xf]  ;;  %v789_v38 = vld [vmem:[#allocation8 + $0x94] sm:$0xf0] }
  0x34   :  { %628 = vmatmul.msk.bf16.vlgmr.msra.gmra.mxu0 %vm167_vm1, %v88_v45  ;;  %629 = vmatmul.msk.bf16.vlgmr.msra.gmra.mxu1 %vm167_vm1, %v88_v45 }
  0x35   :  { %527 = vmatpush.bf16.msrb.mxu0 %v693_v6  ;;  %541 = vmatpush.bf16.msrb.mxu1 %v757_v7  ;;  %v658_v7 = vld [vmem:[#allocation8 + $0x38] sm:$0xf0] }
  0x36   :  { %v661_v10 = vor.u32 %v776_v3, %v658_v7 }
  0x39   :  { %528 = vmatpush.bf16.msrb.mxu0 %v685_v22  ;;  %542 = vmatpush.bf16.msrb.mxu1 %v749_v23  ;;  %v650_v23 = vld [vmem:[#allocation8 + $0x28] sm:$0xf0] }
  0x3a   :  { %v653_v26 = vor.u32 %v774_v19, %v650_v23 }
  0x3d   :  { %529 = vmatpush.bf16.msrb.mxu0 %v677_v40  ;;  %543 = vmatpush.bf16.msrb.mxu1 %v741_v41 }
  0xb1   :  { %v187_v46 = vpop.f32.mrf.mxu0  ;;  %v201_v47 = vpop.f32.mrf.mxu1 }
  0xb9   :  { %v189_v48 = vpop.f32.mrf.mxu0  ;;  %v203_v49 = vpop.f32.mrf.mxu1 }
  0xba   :  { %v206_v50 = vadd.f32 %v189_v48, %v187_v46  ;;  %v213_v51 = vadd.f32 %v203_v49, %v201_v47 }
  0xbc   :  { %v207_v52 = vrot.slane %v206_v50, 4  ;;  %v214_v53 = vrot.slane %v213_v51, 4 }
  0xbe   :  { %v208_v54 = vadd.f32 %v207_v52, %v206_v50  ;;  %v215_v55 = vadd.f32 %v214_v53, %v213_v51  ;;  %v795_v50 = vld [vmem:[#allocation8 + $0xc4] sm:$0xf0]  ;;  %v778_v51 = vld [vmem:[#allocation8 + $0x44] sm:$0xf]  ;;  %v666_v52 = vld [vmem:[#allocation8 + $0x48] sm:$0xf0] }
  0xc0   :  { %v209_v56 = vrot.slane %v208_v54, 2  ;;  %v216_v57 = vrot.slane %v215_v55, 2 }
  0xc2   :  { %v210_v0 = vadd.f32 %v209_v56, %v208_v54  ;;  %v217_v1 = vadd.f32 %v216_v57, %v215_v55  ;;  %v669_v56 = vor.u32 %v778_v51, %v666_v52  ;;  %v794_v57 = vld [vmem:[#allocation8 + $0xc4] sm:$0xf] }
  0xc3   :  { %v733_v59 = vor.u32 %v794_v57, %v730_v58  ;;  %v634_v57 = vld [vmem:[#allocation8 + $0x8] sm:$0xf0]  ;;  %v786_v58 = vld [vmem:[#allocation8 + $0x84] sm:$0xf] }
  0xc4   :  { %v211_v8 = vrot.slane %v210_v0, 1  ;;  %v218_v9 = vrot.slane %v217_v1, 1  ;;  %530 = vmatpush.bf16.msrb.mxu0 %v669_v56 }
  0xc5   :  { %544 = vmatpush.bf16.msrb.mxu1 %v733_v59  ;;  %v698_v59 = vld [vmem:[#allocation8 + $0x88] sm:$0xf0] }
  0xc6   :  { %v212_v16 = vadd.f32 %v211_v8, %v210_v0  ;;  %v219_v17 = vadd.f32 %v218_v9, %v217_v1  ;;  %v657_v0 = vor.u32 %v777_v63, %v656_v62  ;;  %v720_v1 = vld [vmem:[#allocation8 + $0xb0] sm:$0xf]  ;;  %v792_v8 = vld [vmem:[#allocation8 + $0xb4] sm:$0xf]  ;;  %v722_v9 = vld [vmem:[#allocation8 + $0xb8] sm:$0xf0]  ;;  %v701_v63 = vor.u32 %v786_v58, %v698_v59 }
  0xc7   :  { %v721_v6 = vor.u32 %v793_v2, %v720_v1  ;;  %v725_v11 = vor.u32 %v792_v8, %v722_v9 }
  0xc8   :  { %v220_v24 = vmul.f32 0.0625, %v212_v16  ;;  %v221_v25 = vmul.f32 0.0625, %v219_v17  ;;  %531 = vmatpush.bf16.msrb.mxu0 %v661_v10  ;;  %v649_v16 = vor.u32 %v775_v15, %v648_v14  ;;  %v712_v17 = vld [vmem:[#allocation8 + $0xa0] sm:$0xf] }
  0xc9   :  { %545 = vmatpush.bf16.msrb.mxu1 %v725_v11  ;;  %v713_v22 = vor.u32 %v791_v18, %v712_v17  ;;  %v285_v17 = vld [vmem:[%s1031_s3] sm:$0x3] }
  0xca   :  { %v999_v32 = vsub.f32 %v187_v46, %v220_v24  ;;  %v1001_v33 = vsub.f32 %v189_v48, %v220_v24  ;;  %v1003_v34 = vsub.f32 %v201_v47, %v221_v25  ;;  %v1005_v35 = vsub.f32 %v203_v49, %v221_v25  ;;  %v664_v46 = vld [vmem:[#allocation8 + $0x40] sm:$0xf]  ;;  %v779_v47 = vld [vmem:[#allocation8 + $0x44] sm:$0xf0]  ;;  %v790_v24 = vld [vmem:[#allocation8 + $0xa4] sm:$0xf] }
  0xcb   :  { %v728_v48 = vld [vmem:[#allocation8 + $0xc0] sm:$0xf]  ;;  %v665_v49 = vor.u32 %v779_v47, %v664_v46  ;;  %v714_v25 = vld [vmem:[#allocation8 + $0xa8] sm:$0xf0] }
  0xcc   :  { %v226_v42 = vmul.f32 %v999_v32, %v999_v32  ;;  %v228_v43 = vmul.f32 %v1001_v33, %v1001_v33  ;;  %v227_v44 = vmul.f32 %v1003_v34, %v1003_v34  ;;  %v229_v45 = vmul.f32 %v1005_v35, %v1005_v35  ;;  %532 = vmatpush.bf16.msrb.mxu0 %v653_v26 }
  0xcd   :  { %v729_v55 = vor.u32 %v795_v50, %v728_v48  ;;  %502 = vmatpush.bf16.msra.mxu2 %v665_v49  ;;  %v717_v27 = vor.u32 %v790_v24, %v714_v25  ;;  %v632_v48 = vld [vmem:[#allocation8] sm:$0xf]  ;;  %v771_v49 = vld [vmem:[#allocation8 + $0x4] sm:$0xf0] }
  0xce   :  { %v230_v53 = vadd.f32 %v228_v43, %v226_v42  ;;  %v237_v54 = vadd.f32 %v229_v45, %v227_v44  ;;  %v705_v42 = vor.u32 %v789_v38, %v704_v37  ;;  %v642_v43 = vld [vmem:[#allocation8 + $0x18] sm:$0xf0]  ;;  %v788_v44 = vld [vmem:[#allocation8 + $0x94] sm:$0xf]  ;;  %v696_v50 = vld [vmem:[#allocation8 + $0x80] sm:$0xf] }
  0xcf   :  { %516 = vmatpush.bf16.msra.mxu3 %v729_v55  ;;  %546 = vmatpush.bf16.msrb.mxu1 %v717_v27  ;;  %v706_v45 = vld [vmem:[#allocation8 + $0x98] sm:$0xf0]  ;;  %v645_v46 = vor.u32 %v772_v39, %v642_v43  ;;  %v770_v55 = vld [vmem:[#allocation8 + $0x4] sm:$0xf] }
  0xd0   :  { %v231_v60 = vrot.slane %v230_v53, 4  ;;  %v238_v61 = vrot.slane %v237_v54, 4  ;;  %v709_v47 = vor.u32 %v788_v44, %v706_v45  ;;  %v637_v62 = vor.u32 %v770_v55, %v634_v57 }
  0xd1   :  { %503 = vmatpush.bf16.msra.mxu2 %v657_v0  ;;  %533 = vmatpush.bf16.msrb.mxu0 %v645_v46 }
  0xd2   :  { %v232_v4 = vadd.f32 %v231_v60, %v230_v53  ;;  %v239_v5 = vadd.f32 %v238_v61, %v237_v54  ;;  %v633_v53 = vor.u32 %v771_v49, %v632_v48  ;;  %v787_v54 = vld [vmem:[#allocation8 + $0x84] sm:$0xf0] }
  0xd3   :  { %517 = vmatpush.bf16.msra.mxu3 %v721_v6  ;;  %v697_v56 = vor.u32 %v787_v54, %v696_v50  ;;  %547 = vmatpush.bf16.msrb.mxu1 %v709_v47 }
  0xd4   :  { %v233_v12 = vrot.slane %v232_v4, 2  ;;  %v240_v13 = vrot.slane %v239_v5, 2 }
  0xd5   :  { %504 = vmatpush.bf16.msra.mxu2 %v649_v16  ;;  %534 = vmatpush.bf16.msrb.mxu0 %v637_v62 }
  0xd6   :  { %v234_v20 = vadd.f32 %v233_v12, %v232_v4  ;;  %v241_v21 = vadd.f32 %v240_v13, %v239_v5  ;;  %v246_v13 = vld [vmem:[#allocation7] sm:$0x3] }
  0xd7   :  { %518 = vmatpush.bf16.msra.mxu3 %v713_v22  ;;  %548 = vmatpush.bf16.msrb.mxu1 %v701_v63  ;;  %v288_v22 = vperm.slane %v285_v17, 1 }
  0xd8   :  { %v235_v28 = vrot.slane %v234_v20, 1  ;;  %v242_v29 = vrot.slane %v241_v21, 1 }
  0xd9   :  { %505 = vmatpush.bf16.msra.mxu2 %v641_v36 }
  0xda   :  { %v236_v40 = vadd.f32 %v235_v28, %v234_v20  ;;  %v243_v41 = vadd.f32 %v242_v29, %v241_v21  ;;  %v287_v21 = vperm.slane %v285_v17, 0 }
  0xdb   :  { %519 = vmatpush.bf16.msra.mxu3 %v705_v42 }
  0xdc   :  { %v244_v51 = vmul.f32 0.0625, %v236_v40  ;;  %v245_v52 = vmul.f32 0.0625, %v243_v41 }
  0xdd   :  { %506 = vmatpush.bf16.msra.mxu2 %v633_v53 }
  0xde   :  { %v247_v60 = vadd.f32 1e-05, %v244_v51  ;;  %v248_v61 = vadd.f32 1e-05, %v245_v52 }
  0xdf   :  { %520 = vmatpush.bf16.msra.mxu3 %v697_v56 }
  0xe0   :  { %811 = vrsqrt.f32 %v247_v60  ;;  %vm265_vm4 = vweird.f32 %v248_v61  ;;  %vm255_vm6 = vweird.f32 %v247_v60 }
  0xe1   :  { %813 = vrsqrt.f32 %v248_v61 }
  0xe6   :  { %v812_v0 = vpop.eup %811 }
  0xe7   :  { %v814_v1 = vpop.eup %813  ;;  %v250_v2 = vmul.f32 %v812_v0, %v247_v60  ;;  %vm256_vm3 = vweird.f32 %v812_v0 }
  0xe8   :  { %v260_v3 = vmul.f32 %v814_v1, %v248_v61  ;;  %vm266_vm2 = vweird.f32 %v814_v1  ;;  %vm257_vm8 = vmor %vm255_vm6, %vm256_vm3 }
  0xe9   :  { %v251_v4 = vmul.f32 %v812_v0, %v250_v2  ;;  %vm267_vm5 = vmor %vm265_vm4, %vm266_vm2 }
  0xea   :  { %v261_v5 = vmul.f32 %v814_v1, %v260_v3 }
  0xeb   :  { %v252_v6 = vmul.f32 0.5, %v251_v4 }
  0xec   :  { %v262_v7 = vmul.f32 0.5, %v261_v5 }
  0xed   :  { %v253_v8 = vsub.f32 1.5, %v252_v6 }
  0xee   :  { %v263_v9 = vsub.f32 1.5, %v262_v7 }
  0xef   :  { %v254_v10 = vmul.f32 %v812_v0, %v253_v8 }
  0xf0   :  { %v264_v11 = vmul.f32 %v814_v1, %v263_v9 }
  0xf1   :  { %v258_v15 = vsel %vm257_vm8, %v812_v0, %v254_v10 }
  0xf2   :  { %v268_v12 = vsel %vm267_vm5, %v814_v1, %v264_v11 }
  0xf3   :  { %v271_v14 = vrot.slane %v268_v12, 7 }
  0xf5   :  { %v273_v16 = vsel %vm272_vm7, %v258_v15, %v271_v14 }
  0xf6   :  { %v275_v18 = vmul.f32 %v273_v16, %v246_v13 }
  0xf8   :  { %v278_v19 = vperm.slane %v275_v18, 1  ;;  %v277_v20 = vperm.slane %v275_v18, 0 }
  0xfa   :  { %v284_v23 = vmul.f32 %v278_v19, %v1005_v35  ;;  %v281_v24 = vmul.f32 %v277_v20, %v999_v32  ;;  %v283_v25 = vmul.f32 %v277_v20, %v1001_v33  ;;  %v282_v26 = vmul.f32 %v278_v19, %v1003_v34  ;;  %v333_v32 = vld [vmem:[%s1033_s5] sm:$0x3] }
  0xfb   :  { %v336_v33 = vperm.slane %v333_v32, 1  ;;  %v335_v42 = vperm.slane %v333_v32, 0 }
  0xfc   :  { %v291_v27 = vadd.f32 %v287_v21, %v281_v24  ;;  %v293_v28 = vadd.f32 %v287_v21, %v283_v25  ;;  %v292_v29 = vadd.f32 %v288_v22, %v282_v26  ;;  %v294_v30 = vadd.f32 %v288_v22, %v284_v23 }
  0xfe   :  { %v295_v31 = vmax.f32 %v291_v27, 0.0  ;;  %v297_v36 = vmax.f32 %v293_v28, 0.0  ;;  %v296_v37 = vmax.f32 %v292_v29, 0.0  ;;  %v298_v38 = vmax.f32 %v294_v30, 0.0 }
 0x100   :  { %v299_v39 = vpack.c.bf16 %v297_v36, %v295_v31  ;;  %v300_v40 = vpack.c.bf16 %v298_v38, %v296_v37 }
 0x102   :  { %507 = vmatmul.bf16.vlgmr.msra.gmra.mxu2 %v299_v39  ;;  %521 = vmatmul.bf16.vlgmr.msra.gmra.mxu3 %v300_v40 }
 0x103   :  { %535 = vmatmul.bf16.vlgmr.msrb.gmra.mxu0 %v299_v39  ;;  %549 = vmatmul.bf16.vlgmr.msrb.gmra.mxu1 %v300_v40 }
 0x180   :  { %v536_v34 = vpop.f32.mrf.mxu0  ;;  %v550_v35 = vpop.f32.mrf.mxu1 }
 0x181   :  { %v537_v41 = vadd.f32 %v536_v34, %v336_v33 }
 0x183   :  { %v551_v43 = vadd.f32 %v550_v35, %v537_v41 }
 0x185   :  { %556 = vst [vmem:[#allocation10 + $0x8] sm:$0xff] %v551_v43  ;;  %v508_v44 = vpop.f32.mrf.mxu2  ;;  %v522_v45 = vpop.f32.mrf.mxu3 }
 0x186   :  { %v509_v46 = vadd.f32 %v508_v44, %v335_v42 }
 0x188   :  { %v523_v47 = vadd.f32 %v522_v45, %v509_v46  ;;  %v538_v48 = vpop.f32.mrf.mxu0  ;;  %v552_v50 = vpop.f32.mrf.mxu1 }
 0x189   :  { %v539_v49 = vadd.f32 %v538_v48, %v336_v33 }
 0x18a   :  { %555 = vst [vmem:[#allocation10] sm:$0xff] %v523_v47 }
 0x18b   :  { %v553_v51 = vadd.f32 %v552_v50, %v539_v49 }
 0x18d   :  { %558 = vst [vmem:[#allocation10 + $0x18] sm:$0xff] %v553_v51  ;;  %v510_v52 = vpop.f32.mrf.mxu2  ;;  %v524_v54 = vpop.f32.mrf.mxu3 }
 0x18e   :  { %v511_v53 = vadd.f32 %v510_v52, %v335_v42 }
 0x190   :  { %v525_v55 = vadd.f32 %v524_v54, %v511_v53 }
 0x192   :  { %557 = vst [vmem:[#allocation10 + $0x10] sm:$0xff] %v525_v55 }
 0x193   :  { %571 = dma.vmem_to_hbm [thread:$0]  %s564_s19, 512, %s566_s21, [#allocation4], %s950_s22, %s950_s22, %s951_s23  }
 0x194   :  { %941 = dma.done.wait [#allocation4], 512  }
 0x195   :  { %942 = vsyncadd [#allocation4], 4294966784 }
 0x196   :  { %576 = vsyncpa [#allocation3], 1 }
 0x197   :  { %577 = vsyncpa [#allocation6], 1 }
 0x198   :  { %578 = vsyncpa [#allocation9], 1 }
 0x199   :  { %579 = vsyncpa [#allocation4], 1 }

</bundles_post_ra>
